<compile_context>
chip_gen: v6e
topology: v6e:2x2x1
jax: 0.10.0
libtpu: 0.0.40
codegen_flags: <defaults>
</compile_context>

<pallas_src>
import functools

import jax
import jax.numpy as jnp
from jax.experimental import pallas as pl
from jax.experimental.pallas import tpu as pltpu


def _linear_kernel(x_ref, w_ref, b_ref, o_ref):
    # x_ref: [TM, D], w_ref: [D, Np], b_ref: [1, Np], o_ref: [TM, Np]
    acc = jnp.dot(x_ref[...], w_ref[...], preferred_element_type=jnp.float32)
    o_ref[...] = (acc + b_ref[...]).astype(o_ref.dtype)


def _pick_row_tile(M, D, Np, itemsize, budget_bytes=24 * 1024 * 1024):
    """Largest row tile whose double-buffered VMEM footprint fits the budget."""
    for tm in (8192, 4096, 2048, 1024, 512, 256, 128):
        x_bytes = 2 * tm * D * itemsize          # double-buffered input tile
        o_bytes = 2 * tm * Np * itemsize         # double-buffered output tile
        w_bytes = 2 * D * Np * itemsize          # weights (conservatively 2x)
        if x_bytes + o_bytes + w_bytes <= budget_bytes:
            return tm
    return 128


def _fused_linear(x2d, w, b2d):
    """Compute x2d @ w + b with a single Pallas kernel.

    x2d: [M, D], w: [D, Np] (Np a multiple of 128), b2d: [1, Np] float32.
    Returns [M, Np] in x2d.dtype.
    """
    M, D = x2d.shape
    Np = w.shape[1]

    tm = _pick_row_tile(M, D, Np, jnp.dtype(x2d.dtype).itemsize)
    # Single block covering all rows when M is small (full-dim block is always
    # legal regardless of the (8,128) divisibility rule).  Otherwise tm is a
    # power of two >= 128, i.e. a multiple of both the f32 (8) and bf16 (16)
    # sublane granules.
    tm_eff = M if M <= tm else tm

    grid = (pl.cdiv(M, tm_eff),)

    out = pl.pallas_call(
        _linear_kernel,
        out_shape=jax.ShapeDtypeStruct((M, Np), x2d.dtype),
        grid_spec=pltpu.PrefetchScalarGridSpec(
            num_scalar_prefetch=0,
            grid=grid,
            in_specs=[
                pl.BlockSpec((tm_eff, D), lambda i: (i, 0)),  # x row tile
                pl.BlockSpec((D, Np), lambda i: (0, 0)),      # weights (resident)
                pl.BlockSpec((1, Np), lambda i: (0, 0)),      # bias (resident)
            ],
            out_specs=pl.BlockSpec((tm_eff, Np), lambda i: (i, 0)),
        ),
        compiler_params=pltpu.CompilerParams(
            dimension_semantics=("parallel",),
            # 32 MiB scoped VMEM: >= default on v6e/v7x, raises v5e's 16 MiB
            # default; safely below v7x's 64 MiB physical VMEM.
            vmem_limit_bytes=32 * 1024 * 1024,
        ),
    )(x2d, w, b2d)

    return out


def _forward(x, w_all, b_all, *, max_num_sources, compute_dtype):
    """Pure forward: [B, T, D] -> ([B, T, S], [B, T, S, 2])."""
    B, T, D = x.shape
    S = max_num_sources

    x2d = x.reshape(B * T, D).astype(compute_dtype)
    out = _fused_linear(x2d, w_all, b_all)                # [B*T, Np]
    out = out[:, : 3 * S].reshape(B, T, 3 * S)

    source_activity = out[..., :S]                        # [B, T, S]
    direction_of_arrival = out[..., S:].reshape(B, T, S, 2)  # az/el interleaved
    return source_activity, direction_of_arrival


class LocalizationOutputPallas:
    """JAX/Pallas equivalent of the PyTorch LocalizationOutput module."""

    def __init__(self, input_dim: int, max_num_sources: int, key,
                 dtype=jnp.float32):
        self.input_dim = input_dim
        self.max_num_sources = max_num_sources
        self.dtype = dtype

        k = jax.random.split(key, 6)
        # nn.Linear default init: U(-1/sqrt(in), 1/sqrt(in)) for W and b.
        bound = 1.0 / (input_dim ** 0.5)

        def init_w(kk):
            return jax.random.uniform(
                kk, (input_dim, max_num_sources), jnp.float32, -bound, bound)

        def init_b(kk):
            return jax.random.uniform(
                kk, (max_num_sources,), jnp.float32, -bound, bound)

        # Weights stored already transposed ([D, S]) relative to torch's [S, D].
        self.w_sa, self.b_sa = init_w(k[0]), init_b(k[1])
        self.w_az, self.b_az = init_w(k[2]), init_b(k[3])
        self.w_el, self.b_el = init_w(k[4]), init_b(k[5])

        # --- Build the fused, interleaved, lane-padded weight matrix ONCE ---
        S = max_num_sources
        D = input_dim
        # Columns S.. are interleaved az_0, el_0, az_1, el_1, ... so that the
        # kernel output reshapes directly to [B, T, S, 2].
        w_doa = jnp.stack([self.w_az, self.w_el], axis=-1).reshape(D, 2 * S)
        b_doa = jnp.stack([self.b_az, self.b_el], axis=-1).reshape(2 * S)
        w_all = jnp.concatenate([self.w_sa, w_doa], axis=1)        # [D, 3S]
        b_all = jnp.concatenate([self.b_sa, b_doa], axis=0)        # [3S]

        n = 3 * S
        n_pad = max(128, ((n + 127) // 128) * 128)                 # lane-dense
        self._n_valid = n
        self.w_all = jnp.pad(w_all, ((0, 0), (0, n_pad - n))).astype(dtype)
        # Bias stays f32: the kernel adds it in f32 before the final cast
        # (v5e has no native bf16 vector ALU).
        self.b_all = jnp.pad(b_all, (0, n_pad - n)).reshape(1, n_pad).astype(
            jnp.float32)

        # Jit the whole forward so the reshape / slice plumbing around the
        # kernel fuses and doesn't add separate dispatches.
        self._fwd = jax.jit(functools.partial(
            _forward,
            max_num_sources=max_num_sources,
            compute_dtype=dtype,
        ))

    def __call__(self, x):
        # x: [B, T, D] -> ([B, T, S], [B, T, S, 2])
        return self._fwd(x, self.w_all, self.b_all)


if __name__ == "__main__":
    key = jax.random.PRNGKey(0)
    k_in, k_params = jax.random.split(key)

    B, T, D, S = 2, 8, 32, 4
    x = jax.random.normal(k_in, (B, T, D), dtype=jnp.float32)

    module = LocalizationOutputPallas(input_dim=D, max_num_sources=S, key=k_params)
    source_activity, doa = module(x)
    jax.block_until_ready((source_activity, doa))

    # Reference check in plain JAX (same params, same semantics as torch forward).
    sa_ref = x @ module.w_sa + module.b_sa
    az_ref = x @ module.w_az + module.b_az
    el_ref = x @ module.w_el + module.b_el
    doa_ref = jnp.stack([az_ref, el_ref], axis=-1)

    assert source_activity.shape == (B, T, S)
    assert doa.shape == (B, T, S, 2)
    assert jnp.allclose(source_activity, sa_ref, atol=1e-5)
    assert jnp.allclose(doa, doa_ref, atol=1e-5)

    print("KERNEL_OK")
</pallas_src>

<mosaic_0001>
module attributes {stable_mosaic.version = 11 : i64} {
  func.func @_linear_kernel(%arg0: i32, %arg1: memref<16x32xf32, #tpu.memory_space<vmem>>, %arg2: memref<32x128xf32, #tpu.memory_space<vmem>>, %arg3: memref<1x128xf32, #tpu.memory_space<vmem>>, %arg4: memref<16x128xf32, #tpu.memory_space<vmem>>) attributes {dimension_semantics = [#tpu.dimension_semantics<parallel>], iteration_bounds = array<i64: 1>, scalar_prefetch = 0 : i64, scratch_operands = 0 : i64, tpu.core_type = #tpu.core_type<tc>, window_params = [{transform_indices = @transform_0, window_bounds = array<i64: 16, 32>}, {pipeline_mode = #tpu.pipeline_mode<synchronous>, transform_indices = @transform_1, window_bounds = array<i64: 32, 128>}, {pipeline_mode = #tpu.pipeline_mode<synchronous>, transform_indices = @transform_2, window_bounds = array<i64: 1, 128>}, {transform_indices = @transform_3, window_bounds = array<i64: 16, 128>}]} {
    %c0 = arith.constant 0 : index
    %c0_0 = arith.constant 0 : index
    %0 = vector.load %arg1[%c0, %c0_0] : memref<16x32xf32, #tpu.memory_space<vmem>>, vector<16x32xf32>
    %c0_1 = arith.constant 0 : index
    %c0_2 = arith.constant 0 : index
    %1 = vector.load %arg2[%c0_1, %c0_2] : memref<32x128xf32, #tpu.memory_space<vmem>>, vector<32x128xf32>
    %cst = arith.constant dense<0.000000e+00> : vector<16x128xf32>
    %2 = tpu.matmul %0, %1, %cst {dimension_numbers = #tpu.dot_dimension_numbers<[1], [0], [0], [1], [0, 0, 1, 1], [], []>} : vector<16x32xf32>, vector<32x128xf32>, vector<16x128xf32> -> vector<16x128xf32>
    %c0_3 = arith.constant 0 : index
    %c0_4 = arith.constant 0 : index
    %3 = vector.load %arg3[%c0_3, %c0_4] : memref<1x128xf32, #tpu.memory_space<vmem>>, vector<1x128xf32>
    %4 = vector.broadcast %3 : vector<1x128xf32> to vector<16x128xf32>
    %5 = arith.addf %2, %4 : vector<16x128xf32>
    %c0_5 = arith.constant 0 : index
    %c0_6 = arith.constant 0 : index
    %6 = vector.load %arg4[%c0_5, %c0_6] : memref<16x128xf32, #tpu.memory_space<vmem>>, vector<16x128xf32>
    tpu.vector_store %arg4[%c0_5, %c0_6], %5 {strides = array<i32>} : memref<16x128xf32, #tpu.memory_space<vmem>>, vector<16x128xf32>,
    return
  }
  func.func @transform_0(%arg0: i32) -> (i32, i32) {
    %c0_i32 = arith.constant 0 : i32
    %c0_i32_0 = arith.constant 0 : i32
    return %arg0, %c0_i32 : i32, i32
  }
  func.func @transform_1(%arg0: i32) -> (i32, i32) {
    %c0_i32 = arith.constant 0 : i32
    %c0_i32_0 = arith.constant 0 : i32
    %c0_i32_1 = arith.constant 0 : i32
    return %c0_i32, %c0_i32_0 : i32, i32
  }
  func.func @transform_2(%arg0: i32) -> (i32, i32) {
    %c0_i32 = arith.constant 0 : i32
    %c0_i32_0 = arith.constant 0 : i32
    %c0_i32_1 = arith.constant 0 : i32
    return %c0_i32, %c0_i32_0 : i32, i32
  }
  func.func @transform_3(%arg0: i32) -> (i32, i32) {
    %c0_i32 = arith.constant 0 : i32
    %c0_i32_0 = arith.constant 0 : i32
    return %arg0, %c0_i32 : i32, i32
  }
}

</mosaic_0001>

<bundles_post_ra>
// kernel: _forward.1
= control target key start
LH: loop header
LB: loop body
LE: loop exit
PB: predicated region body
PF: predicated region fallthrough
CT: control target
= control target key end

     0   :  { %8 = vsyncpa [#allocation3], 0  ;;  %s254_s0 = inlined_call_operand.hbm [shape: f32[16,32], index: 0, kind: input, shape index: {}]   ;;  %s255_s1 = inlined_call_operand.hbm [shape: f32[32,128], index: 1, kind: input, shape index: {}]   ;;  %s256_s2 = inlined_call_operand.vmem [shape: f32[1,128], index: 2, kind: input, shape index: {}]   ;;  %s257_s3 = inlined_call_operand.vmem [shape: f32[16,128], index: 3, kind: output, shape index: {}]  }
   0x1   :  { %9 = vsyncpa [#allocation5], 0  ;;  %s213_s12 = smov [#allocation2]  }
   0x2   :  { %s15_s13 = sshll.u32 %s213_s12, 4  ;;  %s16_s13 = int_to_ptr.vmem [resolvable:$true] %s15_s13 }
   0x3   :  { %s177_s14 = scalar_lea.vmem %s16_s13, 256  ;;  %p182_p1 = scmp.lt.s32.totalorder %s16_s13, %s16_s13 }
   0x4   :  { %p178_p0 = scmp.ne.s32.totalorder %s16_s13, %s177_s14  ;;  %p183_p2 = scmp.lt.s32.totalorder %s177_s14, %s177_s14 }
   0x6   :  { %p184_p3 = por %p183_p2, %p182_p1 }
   0x8   :  { %p185_p4 = pnand %p184_p3, %p178_p0 }
   0xa   :  { %188 = shalt.err (!%p185_p4)
}
   0xb   :  { %s214_s15 = smov 128   ;;  %s215_s16 = smov 8  }
   0xc   :  { %21 = dma.hbm_to_vmem [thread:$0]  %s254_s0, 256, %s16_s13, [#allocation3], %s214_s15, %s214_s15, %s215_s16  }
   0xd   :  { %s216_s19 = smov [#allocation4]  }
   0xe   :  { %s27_s20 = sshll.u32 %s216_s19, 4  ;;  %s28_s20 = int_to_ptr.vmem [resolvable:$true] %s27_s20 }
   0xf   :  { %s197_s21 = scalar_lea.vmem %s28_s20, 512  ;;  %p202_p6 = scmp.lt.s32.totalorder %s28_s20, %s28_s20 }
  0x10   :  { %p198_p5 = scmp.ne.s32.totalorder %s28_s20, %s197_s21  ;;  %p203_p7 = scmp.lt.s32.totalorder %s197_s21, %s197_s21 }
  0x12   :  { %p204_p8 = por %p203_p7, %p202_p6 }
  0x14   :  { %p205_p9 = pnand %p204_p8, %p198_p5 }
  0x16   :  { %208 = shalt.err (!%p205_p9)
}
  0x17   :  { %33 = dma.hbm_to_vmem [thread:$0]  %s255_s1, 512, %s28_s20, [#allocation5], %s214_s15, %s214_s15, %s215_s16  }
  0x18   :  { %209 = dma.done.wait [#allocation3], 256  }
  0x19   :  { %210 = vsyncadd [#allocation3], 4294967040 }
  0x1a   :  { %211 = dma.done.wait [#allocation5], 512  }
  0x1b   :  { %212 = vsyncadd [#allocation5], 4294966784  ;;  %vm55_vm0 = vcmask 261120   ;;  %v47_v0 = vld [vmem:[#allocation4 + $0x18] sm:$0xff]  ;;  %v46_v1 = vld [vmem:[#allocation4 + $0x10] sm:$0xff] }
  0x1c   :  { %154 = vmatprep.subr.mxu0 %v47_v0  ;;  %v42_v2 = vld [vmem:[#allocation2] sm:$0xff]  ;;  %v45_v3 = vld [vmem:[#allocation4 + $0x8] sm:$0xff]  ;;  %v44_v4 = vld [vmem:[#allocation4] sm:$0xff] }
  0x1d   :  { %155 = vmatpush3.msra.mxu0 %v47_v0  ;;  %162 = vmatprep.mubr.msk.f32.mxu0 %vm55_vm0, %v42_v2  ;;  %v43_v5 = vld [vmem:[#allocation2 + $0x8] sm:$0xff]  ;;  %v145_v6 = vld [vmem:[%s256_s2] ss:$0 sm:$0xff] }
  0x1e   :  { %156 = vmatprep.subr.mxu0 %v46_v1 }
  0x1f   :  { %157 = vmatpush3.msra.mxu0 %v46_v1 }
  0x20   :  { %158 = vmatprep.subr.mxu0 %v45_v3 }
  0x21   :  { %159 = vmatpush3.msra.mxu0 %v45_v3 }
  0x22   :  { %160 = vmatprep.subr.mxu0 %v44_v4 }
  0x23   :  { %161 = vmatpush3.msra.mxu0 %v44_v4 }
  0x24   :  { %163 = vmatmul.mubr.msk.f32.vlgmr.msra.gmra.mxu0 %vm55_vm0, %v43_v5 }
  0xe4   :  { %v164_v7 = vpop.f32.mrf.mxu0 }
  0xe5   :  { %v134_v8 = vadd.f32 %v164_v7, %v145_v6 }
  0xe6   :  { %v128_v9 = vpop.f32.mrf.mxu0 }
  0xe7   :  { %138 = vst [vmem:[%s257_s3 + $0x8] sm:$0xff] %v134_v8  ;;  %v129_v10 = vadd.f32 %v145_v6, %v128_v9 }
  0xe9   :  { %137 = vst [vmem:[%s257_s3] sm:$0xff] %v129_v10 }
  0xea   :  { %143 = vsyncpa [#allocation3], 1 }
  0xeb   :  { %144 = vsyncpa [#allocation5], 1 }

</bundles_post_ra>
